<compile_context>
chip_gen: v7x
topology: tpu7x:2x2x1
jax: 0.10.0
libtpu: 0.0.40
codegen_flags: <defaults>
</compile_context>

<pallas_src>
import functools

import jax
import jax.numpy as jnp
from jax.experimental import pallas as pl
from jax.experimental.pallas import tpu as pltpu

IN_DIM = 28 * 28   # 784
OUT_DIM = 10
LANE = 128


def _round_up(x, m):
    return (x + m - 1) // m * m


def _mlp_kernel(x_ref, w1_ref, b1_ref, w2_ref, b2_ref, o_ref):
    # First linear: bf16 x bf16 -> f32 accumulation on the MXU.
    h = jnp.dot(x_ref[...], w1_ref[...], preferred_element_type=jnp.float32)
    # Bias + ReLU in f32 on the VPU.
    h = jnp.maximum(h + b1_ref[...], 0.0)
    # Second linear: feed the MXU bf16, accumulate in f32.
    y = jnp.dot(h.astype(jnp.bfloat16), w2_ref[...],
                preferred_element_type=jnp.float32)
    o_ref[...] = jnp.maximum(y + b2_ref[...], 0.0)


def prepare_params(w1, b1, w2, b2):
    """Pad weights/biases to lane-aligned shapes and cast weights to bf16.

    w1: (784, hidden), b1: (hidden,), w2: (hidden, 10), b2: (10,)
    (weights stored (in, out) = PyTorch Linear.weight transposed).
    Done once; the padded/bf16 copies are reused across forward calls.
    """
    in_dim, hidden_dim = w1.shape
    out_dim = w2.shape[1]
    assert in_dim == IN_DIM and out_dim == OUT_DIM

    k_pad = _round_up(in_dim, LANE)       # 784 -> 896
    h_pad = _round_up(hidden_dim, LANE)   # 128 -> 128
    n_pad = _round_up(out_dim, LANE)      # 10  -> 128

    w1_p = jnp.pad(w1.astype(jnp.bfloat16),
                   ((0, k_pad - in_dim), (0, h_pad - hidden_dim)))
    b1_p = jnp.pad(b1.astype(jnp.float32),
                   (0, h_pad - hidden_dim)).reshape(1, h_pad)
    w2_p = jnp.pad(w2.astype(jnp.bfloat16),
                   ((0, h_pad - hidden_dim), (0, n_pad - out_dim)))
    b2_p = jnp.pad(b2.astype(jnp.float32),
                   (0, n_pad - out_dim)).reshape(1, n_pad)
    return w1_p, b1_p, w2_p, b2_p


@functools.partial(jax.jit, static_argnames=("in_dim", "out_dim", "block_rows"))
def _forward_padded(x_nchw, w1_p, b1_p, w2_p, b2_p, *,
                    in_dim, out_dim, block_rows):
    B = x_nchw.shape[0]
    k_pad, h_pad = w1_p.shape
    n_pad = w2_p.shape[1]

    # Batch tiling: one grid-less call for small B, batch grid for large B.
    if B <= block_rows:
        b_pad = _round_up(max(B, 1), 8)
        tm = b_pad
        num_tiles = 1
    else:
        b_pad = _round_up(B, block_rows)
        tm = block_rows
        num_tiles = b_pad // block_rows

    # Glue: flatten exactly like x.view(x.size(0), -1); zero-pad; bf16 for MXU.
    x2d = x_nchw.reshape(B, in_dim).astype(jnp.bfloat16)
    x_p = jnp.pad(x2d, ((0, b_pad - B), (0, k_pad - in_dim)))

    out_shape = jax.ShapeDtypeStruct((b_pad, n_pad), jnp.float32)

    if num_tiles == 1:
        # Tiny problem: no grid, every operand is one full VMEM block.
        out = pl.pallas_call(_mlp_kernel, out_shape=out_shape)(
            x_p, w1_p, b1_p, w2_p, b2_p)
    else:
        # Batch grid: x / out tiled over rows, weights stay VMEM-resident
        # (constant index_maps) and the row axis is megacore-parallel.
        out = pl.pallas_call(
            _mlp_kernel,
            out_shape=out_shape,
            grid=(num_tiles,),
            in_specs=[
                pl.BlockSpec((tm, k_pad), lambda i: (i, 0)),
                pl.BlockSpec((k_pad, h_pad), lambda i: (0, 0)),
                pl.BlockSpec((1, h_pad), lambda i: (0, 0)),
                pl.BlockSpec((h_pad, n_pad), lambda i: (0, 0)),
                pl.BlockSpec((1, n_pad), lambda i: (0, 0)),
            ],
            out_specs=pl.BlockSpec((tm, n_pad), lambda i: (i, 0)),
            compiler_params=pltpu.CompilerParams(
                dimension_semantics=("parallel",)),
        )(x_p, w1_p, b1_p, w2_p, b2_p)

    return out[:B, :out_dim]


def backbone_forward(x_nchw, w1, b1, w2, b2, *, block_rows=256):
    """x_nchw: (B, 1, 28, 28) float32.  Returns (B, 10) float32."""
    w1_p, b1_p, w2_p, b2_p = prepare_params(w1, b1, w2, b2)
    return _forward_padded(x_nchw, w1_p, b1_p, w2_p, b2_p,
                           in_dim=w1.shape[0], out_dim=w2.shape[1],
                           block_rows=block_rows)


def init_params(key, in_dim=IN_DIM, hidden_dim=128, out_dim=OUT_DIM):
    """Mimics torch.nn.Linear's U(-1/sqrt(fan_in), 1/sqrt(fan_in)) init.
    Weights stored as (in, out) = transpose of PyTorch's (out, in)."""
    k1, k2, k3, k4 = jax.random.split(key, 4)
    bound1 = 1.0 / jnp.sqrt(in_dim)
    bound2 = 1.0 / jnp.sqrt(hidden_dim)
    w1 = jax.random.uniform(k1, (in_dim, hidden_dim), jnp.float32, -bound1, bound1)
    b1 = jax.random.uniform(k2, (hidden_dim,), jnp.float32, -bound1, bound1)
    w2 = jax.random.uniform(k3, (hidden_dim, out_dim), jnp.float32, -bound2, bound2)
    b2 = jax.random.uniform(k4, (out_dim,), jnp.float32, -bound2, bound2)
    return w1, b1, w2, b2


def _reference(x_nchw, w1, b1, w2, b2):
    """Plain-JAX reference with the same bf16-MXU / f32-accumulate numerics."""
    B = x_nchw.shape[0]
    x2d = x_nchw.reshape(B, -1)
    h = jnp.dot(x2d.astype(jnp.bfloat16), w1.astype(jnp.bfloat16),
                preferred_element_type=jnp.float32)
    h = jnp.maximum(h + b1, 0.0)
    y = jnp.dot(h.astype(jnp.bfloat16), w2.astype(jnp.bfloat16),
                preferred_element_type=jnp.float32)
    return jnp.maximum(y + b2, 0.0)


if __name__ == "__main__":
    key = jax.random.PRNGKey(0)
    k_x, k_p, k_x2 = jax.random.split(key, 3)

    hidden_dim = 128
    w1, b1, w2, b2 = init_params(k_p, hidden_dim=hidden_dim)

    # Small MNIST-like batch: (B=8, C=1, H=28, W=28), NCHW like PyTorch.
    B = 8
    x = jax.random.normal(k_x, (B, 1, 28, 28), dtype=jnp.float32)
    out = jax.block_until_ready(backbone_forward(x, w1, b1, w2, b2))
    ref = _reference(x, w1, b1, w2, b2)
    assert out.shape == (B, 10)
    assert jnp.allclose(out, ref, atol=1e-2, rtol=1e-2)

    # Also exercise the batch-tiled (grid) path with a tiny row tile.
    B2 = 16
    x2 = jax.random.normal(k_x2, (B2, 1, 28, 28), dtype=jnp.float32)
    out2 = jax.block_until_ready(
        backbone_forward(x2, w1, b1, w2, b2, block_rows=8))
    ref2 = _reference(x2, w1, b1, w2, b2)
    assert out2.shape == (B2, 10)
    assert jnp.allclose(out2, ref2, atol=1e-2, rtol=1e-2)

    print("KERNEL_OK")
</pallas_src>

<mosaic_0001>
module attributes {stable_mosaic.version = 11 : i64} {
  func.func @_mlp_kernel(%arg0: memref<8x896xbf16, #tpu.memory_space<vmem>>, %arg1: memref<896x128xbf16, #tpu.memory_space<vmem>>, %arg2: memref<1x128xf32, #tpu.memory_space<vmem>>, %arg3: memref<128x128xbf16, #tpu.memory_space<vmem>>, %arg4: memref<1x128xf32, #tpu.memory_space<vmem>>, %arg5: memref<8x128xf32, #tpu.memory_space<vmem>>) attributes {dimension_semantics = [], scalar_prefetch = 0 : i64, scratch_operands = 0 : i64, tpu.core_type = #tpu.core_type<tc>} {
    %c0 = arith.constant 0 : index
    %c0_0 = arith.constant 0 : index
    %0 = vector.load %arg0[%c0, %c0_0] : memref<8x896xbf16, #tpu.memory_space<vmem>>, vector<8x896xbf16>
    %c0_1 = arith.constant 0 : index
    %c0_2 = arith.constant 0 : index
    %1 = vector.load %arg1[%c0_1, %c0_2] : memref<896x128xbf16, #tpu.memory_space<vmem>>, vector<896x128xbf16>
    %cst = arith.constant dense<0.000000e+00> : vector<8x128xf32>
    %2 = tpu.matmul %0, %1, %cst {dimension_numbers = #tpu.dot_dimension_numbers<[1], [0], [0], [1], [0, 0, 1, 1], [], []>} : vector<8x896xbf16>, vector<896x128xbf16>, vector<8x128xf32> -> vector<8x128xf32>
    %c0_3 = arith.constant 0 : index
    %c0_4 = arith.constant 0 : index
    %3 = vector.load %arg2[%c0_3, %c0_4] : memref<1x128xf32, #tpu.memory_space<vmem>>, vector<1x128xf32>
    %4 = vector.broadcast %3 : vector<1x128xf32> to vector<8x128xf32>
    %5 = arith.addf %2, %4 : vector<8x128xf32>
    %cst_5 = arith.constant 0.000000e+00 : f32
    %6 = vector.broadcast %cst_5 : f32 to vector<8x128xf32>
    %7 = arith.maximumf %5, %6 : vector<8x128xf32>
    %8 = arith.truncf %7 : vector<8x128xf32> to vector<8x128xbf16>
    %c0_6 = arith.constant 0 : index
    %c0_7 = arith.constant 0 : index
    %9 = vector.load %arg3[%c0_6, %c0_7] : memref<128x128xbf16, #tpu.memory_space<vmem>>, vector<128x128xbf16>
    %cst_8 = arith.constant dense<0.000000e+00> : vector<8x128xf32>
    %10 = tpu.matmul %8, %9, %cst_8 {dimension_numbers = #tpu.dot_dimension_numbers<[1], [0], [0], [1], [0, 0, 1, 1], [], []>} : vector<8x128xbf16>, vector<128x128xbf16>, vector<8x128xf32> -> vector<8x128xf32>
    %c0_9 = arith.constant 0 : index
    %c0_10 = arith.constant 0 : index
    %11 = vector.load %arg4[%c0_9, %c0_10] : memref<1x128xf32, #tpu.memory_space<vmem>>, vector<1x128xf32>
    %12 = vector.broadcast %11 : vector<1x128xf32> to vector<8x128xf32>
    %13 = arith.addf %10, %12 : vector<8x128xf32>
    %cst_11 = arith.constant 0.000000e+00 : f32
    %14 = vector.broadcast %cst_11 : f32 to vector<8x128xf32>
    %15 = arith.maximumf %13, %14 : vector<8x128xf32>
    %c0_12 = arith.constant 0 : index
    %c0_13 = arith.constant 0 : index
    %16 = vector.load %arg5[%c0_12, %c0_13] : memref<8x128xf32, #tpu.memory_space<vmem>>, vector<8x128xf32>
    tpu.vector_store %arg5[%c0_12, %c0_13], %15 {strides = array<i32>} : memref<8x128xf32, #tpu.memory_space<vmem>>, vector<8x128xf32>,
    return
  }
}

</mosaic_0001>

<bundles_post_ra>
// kernel: _forward_padded.1
= control target key start
LH: loop header
LB: loop body
LE: loop exit
PB: predicated region body
PF: predicated region fallthrough
CT: control target
= control target key end

     0   :  { %v1090_v42 = vmov 0.0   ;;  %vm1091_vm0 = vmmov 0   ;;  %s1365_s0 = inlined_call_operand.vmem [shape: bf16[8,896], index: 0, kind: input, shape index: {}]   ;;  %s1366_s1 = inlined_call_operand.vmem [shape: bf16[896,128], index: 1, kind: input, shape index: {}]   ;;  %s1367_s2 = inlined_call_operand.vmem [shape: f32[1,128], index: 2, kind: input, shape index: {}]   ;;  %s1368_s3 = inlined_call_operand.vmem [shape: bf16[128,128], index: 3, kind: input, shape index: {}]   ;;  %s1369_s4 = inlined_call_operand.vmem [shape: f32[1,128], index: 4, kind: input, shape index: {}]   ;;  %s1370_s5 = inlined_call_operand.hbm [shape: f32[8,128], index: 5, kind: output, shape index: {}]  }
   0x1   :  { %v995_v0 = vld [vmem:[%s1366_s1 + $0x40] sm:$0xff]   ;;  %v999_v4 = vld [vmem:[%s1366_s1 + $0x48] sm:$0xff]   ;;  %v1003_v8 = vld [vmem:[%s1366_s1 + $0x50] sm:$0xff]  }
   0x2   :  { %v996_v1 = vld [vmem:[%s1366_s1] sm:$0xff]   ;;  %868 = vmatprep.subr.bf16.mxu0 %v995_v0  ;;  %v1000_v5 = vld [vmem:[%s1366_s1 + $0x8] sm:$0xff]   ;;  %v1004_v9 = vld [vmem:[%s1366_s1 + $0x10] sm:$0xff]  }
   0x3   :  { %v997_v2 = vld [vmem:[%s1366_s1 + $0xc0] sm:$0xff]   ;;  %869 = vmatpush3.bf16.msra.mxu0 %v996_v1  ;;  %v1001_v6 = vld [vmem:[%s1366_s1 + $0xc8] sm:$0xff]   ;;  %v1005_v10 = vld [vmem:[%s1366_s1 + $0xd0] sm:$0xff]  }
   0x4   :  { %v998_v3 = vld [vmem:[%s1366_s1 + $0x80] sm:$0xff]   ;;  %890 = vmatprep.subr.bf16.mxu1 %v997_v2  ;;  %870 = vmatprep.subr.bf16.mxu0 %v999_v4  ;;  %v1002_v7 = vld [vmem:[%s1366_s1 + $0x88] sm:$0xff]   ;;  %v1006_v11 = vld [vmem:[%s1366_s1 + $0x90] sm:$0xff]  }
   0x5   :  { %891 = vmatpush3.bf16.msra.mxu1 %v998_v3  ;;  %v1007_v12 = vld [vmem:[%s1366_s1 + $0x58] sm:$0xff]   ;;  %v1011_v16 = vld [vmem:[%s1366_s1 + $0x60] sm:$0xff]   ;;  %v1015_v20 = vld [vmem:[%s1366_s1 + $0x68] sm:$0xff]  }
   0x6   :  { %892 = vmatprep.subr.bf16.mxu1 %v1001_v6  ;;  %v1008_v13 = vld [vmem:[%s1366_s1 + $0x18] sm:$0xff]   ;;  %v1012_v17 = vld [vmem:[%s1366_s1 + $0x20] sm:$0xff]   ;;  %v1016_v21 = vld [vmem:[%s1366_s1 + $0x28] sm:$0xff]  }
   0x7   :  { %871 = vmatpush3.bf16.msra.mxu0 %v1000_v5  ;;  %v1009_v14 = vld [vmem:[%s1366_s1 + $0xd8] sm:$0xff]   ;;  %v1013_v18 = vld [vmem:[%s1366_s1 + $0xe0] sm:$0xff]   ;;  %v1017_v22 = vld [vmem:[%s1366_s1 + $0xe8] sm:$0xff]  }
   0x8   :  { %872 = vmatprep.subr.bf16.mxu0 %v1003_v8  ;;  %v1010_v15 = vld [vmem:[%s1366_s1 + $0x98] sm:$0xff]   ;;  %v1014_v19 = vld [vmem:[%s1366_s1 + $0xa0] sm:$0xff]   ;;  %v1018_v23 = vld [vmem:[%s1366_s1 + $0xa8] sm:$0xff]  }
   0x9   :  { %893 = vmatpush3.bf16.msra.mxu1 %v1002_v7  ;;  %v1019_v24 = vld [vmem:[%s1366_s1 + $0x70] sm:$0xff]   ;;  %v1023_v28 = vld [vmem:[%s1366_s1 + $0x78] sm:$0xff]   ;;  %v22_v31 = vld [vmem:[%s1365_s0] sm:$0xff] }
   0xa   :  { %894 = vmatprep.subr.bf16.mxu1 %v1005_v10  ;;  %v1020_v25 = vld [vmem:[%s1366_s1 + $0x30] sm:$0xff]   ;;  %v1024_v29 = vld [vmem:[%s1366_s1 + $0x38] sm:$0xff]   ;;  %v796_v32 = vcombine.low %v22_v31, %v22_v31  ;;  %v797_v33 = vcombine.high %v22_v31, %v22_v31  ;;  %v1029_v35 = vld [vmem:[%s1366_s1 + $0x140] sm:$0xff]  }
   0xb   :  { %873 = vmatpush3.bf16.msra.mxu0 %v1004_v9  ;;  %v1021_v26 = vld [vmem:[%s1366_s1 + $0xf0] sm:$0xff]   ;;  %v1025_v30 = vld [vmem:[%s1366_s1 + $0xf8] sm:$0xff]   ;;  %v23_v36 = vld [vmem:[%s1365_s0 + $0x8] sm:$0xff] }
   0xc   :  { %874 = vmatprep.subr.bf16.mxu0 %v1007_v12  ;;  %v1022_v27 = vld [vmem:[%s1366_s1 + $0xb0] sm:$0xff]   ;;  %v1028_v34 = vld [vmem:[%s1366_s1 + $0xb8] sm:$0xff]   ;;  %538 = vmatprep.mubr.bf16.mxu0 %v797_v33  ;;  %v798_v37 = vcombine.low %v23_v36, %v23_v36  ;;  %v799_v38 = vcombine.high %v23_v36, %v23_v36  ;;  %v1032_v39 = vld [vmem:[%s1366_s1 + $0x100] sm:$0xff]  }
   0xd   :  { %895 = vmatpush3.bf16.msra.mxu1 %v1006_v11  ;;  %v1033_v40 = vld [vmem:[%s1366_s1 + $0x180] sm:$0xff]   ;;  %v1034_v41 = vld [vmem:[%s1366_s1 + $0x148] sm:$0xff]   ;;  %v1037_v45 = vld [vmem:[%s1366_s1 + $0x150] sm:$0xff]  }
   0xe   :  { %896 = vmatprep.subr.bf16.mxu1 %v1009_v14  ;;  %578 = vmatprep.mubr.bf16.mxu1 %v799_v38  ;;  %v1035_v43 = vld [vmem:[%s1366_s1 + $0x108] sm:$0xff]   ;;  %v1038_v46 = vld [vmem:[%s1366_s1 + $0x110] sm:$0xff]   ;;  %v1040_v48 = vld [vmem:[%s1366_s1 + $0x158] sm:$0xff]  }
   0xf   :  { %875 = vmatpush3.bf16.msra.mxu0 %v1008_v13  ;;  %v1036_v44 = vld [vmem:[%s1366_s1 + $0x188] sm:$0xff]   ;;  %v1039_v47 = vld [vmem:[%s1366_s1 + $0x190] sm:$0xff]   ;;  %v1041_v49 = vld [vmem:[%s1366_s1 + $0x118] sm:$0xff]  }
  0x10   :  { %876 = vmatprep.subr.bf16.mxu0 %v1011_v16  ;;  %v1043_v50 = vld [vmem:[%s1366_s1 + $0x160] sm:$0xff]   ;;  %v1042_v51 = vld [vmem:[%s1366_s1 + $0x198] sm:$0xff]   ;;  %v1046_v53 = vld [vmem:[%s1366_s1 + $0x168] sm:$0xff]  }
  0x11   :  { %897 = vmatpush3.bf16.msra.mxu1 %v1010_v15  ;;  %v1044_v52 = vld [vmem:[%s1366_s1 + $0x120] sm:$0xff]   ;;  %v1047_v55 = vld [vmem:[%s1366_s1 + $0x128] sm:$0xff]   ;;  %v1049_v56 = vld [vmem:[%s1366_s1 + $0x170] sm:$0xff]  }
  0x12   :  { %898 = vmatprep.subr.bf16.mxu1 %v1013_v18  ;;  %v1045_v54 = vld [vmem:[%s1366_s1 + $0x1a0] sm:$0xff]   ;;  %v1048_v57 = vld [vmem:[%s1366_s1 + $0x1a8] sm:$0xff]   ;;  %v1050_v58 = vld [vmem:[%s1366_s1 + $0x130] sm:$0xff]  }
  0x13   :  { %877 = vmatpush3.bf16.msra.mxu0 %v1012_v17  ;;  %v24_v59 = vld [vmem:[%s1365_s0 + $0x10] sm:$0xff]  ;;  %v1052_v62 = vld [vmem:[%s1366_s1 + $0x178] sm:$0xff]  }
  0x14   :  { %878 = vmatprep.subr.bf16.mxu0 %v1015_v20  ;;  %v1051_v60 = vld [vmem:[%s1366_s1 + $0x1b0] sm:$0xff]   ;;  %v801_v61 = vcombine.high %v24_v59, %v24_v59  ;;  %v1053_v63 = vld [vmem:[%s1366_s1 + $0x138] sm:$0xff]   ;;  %v800_v1 = vcombine.low %v24_v59, %v24_v59 }
  0x15   :  { %899 = vmatpush3.bf16.msra.mxu1 %v1014_v19  ;;  %v1056_v0 = vld [vmem:[%s1366_s1 + $0x1b8] sm:$0xff]  }
  0x16   :  { %900 = vmatprep.subr.bf16.mxu1 %v1017_v22 }
  0x17   :  { %879 = vmatpush3.bf16.msra.mxu0 %v1016_v21 }
  0x18   :  { %880 = vmatprep.subr.bf16.mxu0 %v1019_v24 }
  0x19   :  { %901 = vmatpush3.bf16.msra.mxu1 %v1018_v23 }
  0x1a   :  { %902 = vmatprep.subr.bf16.mxu1 %v1021_v26 }
  0x1b   :  { %881 = vmatpush3.bf16.msra.mxu0 %v1020_v25 }
  0x1c   :  { %882 = vmatprep.subr.bf16.mxu0 %v1023_v28 }
  0x1d   :  { %903 = vmatpush3.bf16.msra.mxu1 %v1022_v27 }
  0x1e   :  { %904 = vmatprep.subr.bf16.mxu1 %v1025_v30 }
  0x1f   :  { %883 = vmatpush3.bf16.msra.mxu0 %v1024_v29 }
  0x20   :  { %912 = vmatprep.subr.bf16.mxu0 %v1029_v35 }
  0x21   :  { %905 = vmatpush3.bf16.msra.mxu1 %v1028_v34 }
  0x22   :  { %539 = vmatmul.mubr.bf16.vlgmr.msra.gmra.mrb[0].mxu0 %v796_v32  ;;  %952 = vmatprep.subr.bf16.mxu1 %v1090_v42 }
  0x23   :  { %913 = vmatpush3.bf16.msra.mxu0 %v1032_v39  ;;  %618 = vmatprep.mubr.bf16.mxu0 %v801_v61 }
  0x24   :  { %579 = vmatmul.mubr.bf16.vlgmr.msra.gmra.mrb[0].mxu1 %v798_v37  ;;  %914 = vmatprep.subr.bf16.mxu0 %v1034_v41 }
  0x25   :  { %953 = vmatpush3.bf16.msra.mxu1 %v1033_v40  ;;  %968 = vmatprep.mubr.msk.bf16.mxu1 %vm1091_vm0, %v1090_v42 }
  0x26   :  { %954 = vmatprep.subr.bf16.mxu1 %v1090_v42 }
  0x27   :  { %915 = vmatpush3.bf16.msra.mxu0 %v1035_v43 }
  0x28   :  { %916 = vmatprep.subr.bf16.mxu0 %v1037_v45 }
  0x29   :  { %955 = vmatpush3.bf16.msra.mxu1 %v1036_v44 }
  0x2a   :  { %956 = vmatprep.subr.bf16.mxu1 %v1090_v42 }
  0x2b   :  { %917 = vmatpush3.bf16.msra.mxu0 %v1038_v46 }
  0x2c   :  { %918 = vmatprep.subr.bf16.mxu0 %v1040_v48 }
  0x2d   :  { %957 = vmatpush3.bf16.msra.mxu1 %v1039_v47 }
  0x2e   :  { %958 = vmatprep.subr.bf16.mxu1 %v1090_v42 }
  0x2f   :  { %919 = vmatpush3.bf16.msra.mxu0 %v1041_v49 }
  0x30   :  { %920 = vmatprep.subr.bf16.mxu0 %v1043_v50 }
  0x31   :  { %959 = vmatpush3.bf16.msra.mxu1 %v1042_v51 }
  0x32   :  { %960 = vmatprep.subr.bf16.mxu1 %v1090_v42 }
  0x33   :  { %921 = vmatpush3.bf16.msra.mxu0 %v1044_v52 }
  0x34   :  { %922 = vmatprep.subr.bf16.mxu0 %v1046_v53 }
  0x35   :  { %961 = vmatpush3.bf16.msra.mxu1 %v1045_v54 }
  0x36   :  { %962 = vmatprep.subr.bf16.mxu1 %v1090_v42 }
  0x37   :  { %923 = vmatpush3.bf16.msra.mxu0 %v1047_v55 }
  0x38   :  { %924 = vmatprep.subr.bf16.mxu0 %v1049_v56 }
  0x39   :  { %963 = vmatpush3.bf16.msra.mxu1 %v1048_v57 }
  0x3a   :  { %964 = vmatprep.subr.bf16.mxu1 %v1090_v42 }
  0x3b   :  { %925 = vmatpush3.bf16.msra.mxu0 %v1050_v58 }
  0x3c   :  { %926 = vmatprep.subr.bf16.mxu0 %v1052_v62 }
  0x3d   :  { %965 = vmatpush3.bf16.msra.mxu1 %v1051_v60 }
  0x3e   :  { %966 = vmatprep.subr.bf16.mxu1 %v1090_v42 }
  0x3f   :  { %10 = vsyncpa [#allocation3], 0  ;;  %927 = vmatpush3.bf16.msra.mxu0 %v1053_v63  ;;  %v1057_v2 = vld [vmem:[%s1365_s0 + $0x18] ss:$0 sps:$4 sm:$0xff]   ;;  %v1058_v3 = vld [vmem:[%s1368_s3] sm:$0xff]   ;;  %s1092_s29 = smov [#allocation2]  }
  0x40   :  { %972 = vmatprep.subr.bf16.mxu0 %v1090_v42  ;;  %v1059_v4 = vld [vmem:[%s1368_s3 + $0x8] sm:$0xff]   ;;  %v1060_v5 = vld [vmem:[%s1368_s3 + $0x10] sm:$0xff]   ;;  %v1061_v6 = vld [vmem:[%s1368_s3 + $0x18] sm:$0xff]   ;;  %s787_s30 = sshll.u32 %s1092_s29, 4  ;;  %s788_s30 = int_to_ptr.vmem [resolvable:$true] %s787_s30 }
  0x41   :  { %967 = vmatpush3.bf16.msra.mxu1 %v1056_v0  ;;  %v1062_v7 = vld [vmem:[%s1368_s3 + $0x20] sm:$0xff]   ;;  %v1063_v8 = vld [vmem:[%s1368_s3 + $0x28] sm:$0xff]   ;;  %v1064_v9 = vld [vmem:[%s1368_s3 + $0x30] sm:$0xff]   ;;  %s1066_s6 = scalar_lea.vmem %s788_s30, 128  ;;  %p1071_p1 = scmp.lt.s32.totalorder %s788_s30, %s788_s30 }
  0x42   :  { %619 = vmatmul.mubr.bf16.vlgmr.msra.gmra.mrb[4].mxu0 %v800_v1  ;;  %v1065_v10 = vld [vmem:[%s1368_s3 + $0x38] sm:$0xff]   ;;  %v795_v12 = vld [vmem:[%s1367_s2] ss:$0 sm:$0xff]  ;;  %p1067_p0 = scmp.ne.s32.totalorder %s788_s30, %s1066_s6  ;;  %p1072_p2 = scmp.lt.s32.totalorder %s1066_s6, %s1066_s6 }
  0x43   :  { %988 = vmatprep.mubr.msk.bf16.mxu0 %vm1091_vm0, %v1090_v42  ;;  %973 = vmatpush3.bf16.msra.mxu0 %v1058_v3  ;;  %v859_v37 = vld [vmem:[%s1369_s4] ss:$0 sm:$0xff] }
  0x44   :  { %969 = vmatmul.mubr.bf16.vlgmr.msra.gmra.mrb[4].mxu1 %v1057_v2  ;;  %974 = vmatprep.subr.bf16.mxu0 %v1090_v42  ;;  %p1073_p3 = por %p1072_p2, %p1071_p1 }
  0x46   :  { %p1074_p4 = pnand %p1073_p3, %p1067_p0 }
  0x47   :  { %975 = vmatpush3.bf16.msra.mxu0 %v1059_v4 }
  0x48   :  { %976 = vmatprep.subr.bf16.mxu0 %v1090_v42 }
  0x4b   :  { %977 = vmatpush3.bf16.msra.mxu0 %v1060_v5 }
  0x4c   :  { %978 = vmatprep.subr.bf16.mxu0 %v1090_v42 }
  0x4f   :  { %979 = vmatpush3.bf16.msra.mxu0 %v1061_v6 }
  0x50   :  { %980 = vmatprep.subr.bf16.mxu0 %v1090_v42 }
  0x53   :  { %981 = vmatpush3.bf16.msra.mxu0 %v1062_v7 }
  0x54   :  { %982 = vmatprep.subr.bf16.mxu0 %v1090_v42 }
  0x57   :  { %983 = vmatpush3.bf16.msra.mxu0 %v1063_v8 }
  0x58   :  { %984 = vmatprep.subr.bf16.mxu0 %v1090_v42 }
  0x5b   :  { %985 = vmatpush3.bf16.msra.mxu0 %v1064_v9 }
  0x5c   :  { %986 = vmatprep.subr.bf16.mxu0 %v1090_v42 }
  0x5f   :  { %987 = vmatpush3.bf16.msra.mxu0 %v1065_v10 }
  0xf5   :  { %v884_v11 = vpop.f32.mrb[0].mxu0 }
  0xf6   :  { %v885_v13 = vpop.f32.mrb[1].mxu0 }
  0xf7   :  { %v886_v14 = vadd.f32 %v885_v13, %v884_v11  ;;  %v887_v15 = vpop.f32.mrb[2].mxu0  ;;  %v906_v16 = vpop.f32.mrb[0].mxu1 }
  0xf8   :  { %v888_v17 = vpop.f32.mrb[3].mxu0  ;;  %v907_v18 = vpop.f32.mrb[1].mxu1 }
  0xf9   :  { %v541_v19 = vadd.f32 %v886_v14, %v795_v12  ;;  %v908_v20 = vadd.f32 %v907_v18, %v906_v16  ;;  %v909_v21 = vpop.f32.mrb[2].mxu1 }
  0xfa   :  { %v910_v22 = vpop.f32.mrb[3].mxu1 }
  0xfb   :  { %v581_v23 = vadd.f32 %v908_v20, %v541_v19 }
 0x115   :  { %v928_v24 = vpop.f32.mrb[4].mxu0 }
 0x116   :  { %v929_v25 = vpop.f32.mrb[5].mxu0 }
 0x117   :  { %v930_v26 = vadd.f32 %v929_v25, %v928_v24  ;;  %v931_v27 = vpop.f32.mrb[6].mxu0  ;;  %v660_v28 = vpop.f32.mrb[4].mxu1 }
 0x118   :  { %v932_v29 = vpop.f32.mrb[7].mxu0  ;;  %v970_v30 = vpop.f32.mrb[5].mxu1 }
 0x119   :  { %v621_v31 = vadd.f32 %v930_v26, %v581_v23  ;;  %v663_v32 = vpop.f32.mrb[6].mxu1 }
 0x11a   :  { %v971_v33 = vpop.f32.mrb[7].mxu1 }
 0x11b   :  { %v661_v34 = vadd.f32 %v660_v28, %v621_v31 }
 0x11d   :  { %v666_v35 = vmax.f32 %v661_v34, 0.0 }
 0x11f   :  { %v667_v36 = vpack.c.bf16 %v666_v35, %v666_v35 }
 0x121   :  { %989 = vmatmul.mubr.bf16.vlgmr.msra.gmra.mrb[8].mxu0 %v667_v36 }
 0x1f4   :  { %v773_v38 = vpop.f32.mrb[8].mxu0 }
 0x1f5   :  { %v774_v39 = vadd.f32 %v859_v37, %v773_v38  ;;  %v990_v40 = vpop.f32.mrb[9].mxu0 }
 0x1f6   :  { %v776_v41 = vpop.f32.mrb[10].mxu0 }
 0x1f7   :  { %v779_v42 = vmax.f32 %v774_v39, 0.0  ;;  %v991_v43 = vpop.f32.mrb[11].mxu0 }
 0x1f9   :  { %780 = vst [vmem:[#allocation2] sm:$0xff] %v779_v42 }
 0x1fa   :  { %1077 = shalt.err (!%p1074_p4)
}
 0x1fb   :  { %s1078_s4 = scalar_lea.hbm %s1370_s5, 128 }
 0x1fc   :  { %p1079_p5 = scmp.ne.s32.totalorder %s1370_s5, %s1078_s4  ;;  %p1082_p6 = scmp.lt.u32.totalorder %s1078_s4, %s1370_s5 }
 0x1fe   :  { %p1084_p7 = pnand %p1082_p6, %p1079_p5 }
 0x200   :  { %1087 = shalt.err (!%p1084_p7)
}
 0x201   :  { %790 = dma.vmem_to_hbm [thread:$0]  %s788_s30, 128, %s1370_s5, [#allocation3]  }
 0x202   :  { %1088 = dma.done.wait [#allocation3], 128  }
 0x203   :  { %1089 = vsyncadd [#allocation3], 4294967168 }
 0x204   :  { %794 = vsyncpa [#allocation3], 1 }

</bundles_post_ra>
